<compile_context>
chip_gen: v7x
topology: tpu7x:2x2x1
jax: 0.10.0
libtpu: 0.0.40
codegen_flags: <defaults>
</compile_context>

<pallas_src>
import functools
import math

import jax
import jax.numpy as jnp
from jax import lax
from jax.experimental import pallas as pl
from jax.experimental.pallas import tpu as pltpu

K = 3      # kernel_size (module default)
PAD = 1    # padding      (module default); stride = 1


def _cdiv(a, b):
    return -(-a // b)


def _round_up(a, b):
    return _cdiv(a, b) * b


def _masked_conv_kernel(x_ref, m_ref, halo_ref, w_ref, b_ref, o_ref, *,
                        seq_len, seq_tile, tail_mask):
    # x_ref   : (1, TL, C_in)       current sequence tile (one batch element)
    # m_ref   : (1, TL, 1)          mask tile
    # halo_ref: (1, 1, 2, C_in)     row 0: masked x[t*TL - 1] (zeros at left border)
    #                               row 1: masked x[(t+1)*TL] (zeros at right border)
    # w_ref   : (K, C_in, C_out)    conv weight, tap-major (bf16 or f32)
    # b_ref   : (1, C_out)          conv bias (f32)
    # o_ref   : (1, TL, C_out)
    f32 = jnp.float32

    x = x_ref[0].astype(f32)                       # (TL, C_in)
    m = m_ref[0].astype(f32)                       # (TL, 1)
    xm = x * m                                     # masked input (f32)

    tl = xm.shape[0]
    # (TL, 1) iota column -- broadcast inside jnp.where, no full-tile iota.
    row = lax.broadcasted_iota(jnp.int32, (tl, 1), 0)

    if tail_mask:
        # cdiv grid: the last tile may run past L; zero the invalid rows so the
        # stale VMEM contents there (possibly NaN) never reach the conv taps.
        base = pl.program_id(1) * seq_tile
        xm = jnp.where(row + base < seq_len, xm, 0.0)

    halo = halo_ref[0, 0].astype(f32)              # (2, C_in)
    lo = halo[0:1, :]                              # (1, C_in)
    hi = halo[1:2, :]                              # (1, C_in)

    # Shift along the sequence (sublane) axis on the XLU; patch the single
    # wrapped row with the halo row from the neighbouring tile.
    prev = jnp.where(row == 0, lo, pltpu.roll(xm, shift=1, axis=0))            # x[l-1]
    nxt = jnp.where(row == tl - 1, hi, pltpu.roll(xm, shift=tl - 1, axis=0))    # x[l+1]

    cdt = w_ref.dtype                              # bf16 fast path or f32
    # Back-to-back dots, f32 accumulation (v7x MRB can accumulate in place).
    acc = jnp.dot(prev.astype(cdt), w_ref[0], preferred_element_type=f32)
    acc = acc + jnp.dot(xm.astype(cdt), w_ref[1], preferred_element_type=f32)
    acc = acc + jnp.dot(nxt.astype(cdt), w_ref[2], preferred_element_type=f32)

    out = jnp.maximum(acc + b_ref[...].astype(f32), 0.0)      # bias + ReLU epilogue
    o_ref[0] = out.astype(o_ref.dtype)


def _vmem_capacity_bytes():
    """Per-core VMEM capacity (generation-aware); conservative fallback = 64 MiB."""
    cap = 0
    try:
        info = pltpu.get_tpu_info()
        cap = int(getattr(info, "vmem_capacity_bytes", 0) or 0)
    except Exception:
        cap = 0
    if cap <= 0:
        cap = 64 * 1024 * 1024
    return cap


def _choose_seq_tile(B, L, C_in, C_out, in_item, w_item, budget, max_seq_tile):
    """Largest sequence tile (multiple of 8) that fits the VMEM budget, trimmed
    so the grid still has enough steps for pipelining / v7x megacore."""
    # Per-sequence-row, double-buffered VMEM bytes: input tile + output tile +
    # lane-sparse mask column ((TL, 1) f32 pads every row to a 512 B VMEM line).
    row_bytes = 2 * (C_in * in_item + C_out * in_item + 512)
    fixed = 2 * (K * C_in * C_out * w_item + 4 * C_out + 8 * C_in) + (1 << 20)
    tl_vmem = max(8, (budget - fixed) // row_bytes)

    tl = min(int(max_seq_tile), int(tl_vmem))
    # Keep >= ~16 total grid steps (8 per core on v7x), but never shrink tiles
    # below ~2048 rows chasing step count (per-step overhead ~0.35 us).
    target_steps = 16
    if B * _cdiv(L, tl) < target_steps:
        nl_want = max(1, _cdiv(target_steps, B))
        tl_steps = _round_up(_cdiv(L, nl_want), 8)
        tl = min(tl, max(tl_steps, 2048))
    tl = min(tl, _round_up(L, 8))       # never bigger than (rounded-up) L
    tl = max(8, (tl // 8) * 8)          # sublane-aligned
    return tl


def masked_cnn_forward(inputs, mask, weight, bias, *, use_bf16=True, max_seq_tile=8192):
    """inputs: (B, L, C_in), mask: (B, L, 1) (or (B, L)),
    weight: (C_out, C_in, K) [PyTorch Conv1d layout], bias: (C_out,)."""
    B, L, C_in = inputs.shape
    C_out = weight.shape[0]
    assert weight.shape == (C_out, C_in, K), "kernel specialized to kernel_size=3"
    if mask.ndim == 2:
        mask = mask[:, :, None]
    assert mask.shape == (B, L, 1)

    dt = inputs.dtype
    f32 = jnp.float32
    in_item = jnp.dtype(dt).itemsize
    w_item = 2 if use_bf16 else jnp.dtype(weight.dtype).itemsize

    # ---- generation-aware VMEM budget & tile selection ----------------------
    vmem_cap = _vmem_capacity_bytes()
    budget = int(vmem_cap * 0.70)       # headroom for Mosaic scratch / semaphores
    TL = _choose_seq_tile(B, L, C_in, C_out, in_item, w_item, budget, max_seq_tile)
    nL = _cdiv(L, TL)
    needs_tail = (L % TL) != 0

    # ---- weights tap-major, bf16 for the MXU fast path -----------------------
    w_tap = jnp.transpose(weight, (2, 1, 0))        # (K, C_in, C_out)
    if use_bf16:
        w_tap = w_tap.astype(jnp.bfloat16)
    b2 = bias.reshape(1, C_out).astype(f32)

    # ---- halo rows: one (2, C_in) pair per tile, merged into a single stream --
    # Touches only ~2/TL of the tensor; masked in f32 like the interior rows.
    zrow = jnp.zeros((B, 1, C_in), dtype=f32)
    if nL > 1:
        lo_sl = slice(TL - 1, (nL - 1) * TL, TL)    # rows t*TL - 1,  t = 1..nL-1
        hi_sl = slice(TL, L, TL)                    # rows t*TL,      t = 1..nL-1
        lo_rows = inputs[:, lo_sl, :].astype(f32) * mask[:, lo_sl, :].astype(f32)
        hi_rows = inputs[:, hi_sl, :].astype(f32) * mask[:, hi_sl, :].astype(f32)
        halo_lo = jnp.concatenate([zrow, lo_rows], axis=1)     # (B, nL, C_in)
        halo_hi = jnp.concatenate([hi_rows, zrow], axis=1)     # (B, nL, C_in)
    else:
        halo_lo = zrow
        halo_hi = zrow
    halo = jnp.stack([halo_lo, halo_hi], axis=2)                # (B, nL, 2, C_in)

    kern = functools.partial(_masked_conv_kernel,
                             seq_len=L, seq_tile=TL, tail_mask=needs_tail)

    grid_spec = pltpu.PrefetchScalarGridSpec(
        num_scalar_prefetch=0,
        grid=(B, nL),
        in_specs=[
            pl.BlockSpec((1, TL, C_in), lambda b, t: (b, t, 0)),
            pl.BlockSpec((1, TL, 1), lambda b, t: (b, t, 0)),
            pl.BlockSpec((1, 1, 2, C_in), lambda b, t: (b, t, 0, 0)),
            # Constant index_map -> weights/bias DMA'd once, not per grid step.
            pl.BlockSpec((K, C_in, C_out), lambda b, t: (0, 0, 0)),
            pl.BlockSpec((1, C_out), lambda b, t: (0, 0)),
        ],
        out_specs=pl.BlockSpec((1, TL, C_out), lambda b, t: (b, t, 0)),
    )

    out = pl.pallas_call(
        kern,
        out_shape=jax.ShapeDtypeStruct((B, L, C_out), dt),
        grid_spec=grid_spec,
        compiler_params=pltpu.CompilerParams(
            dimension_semantics=("parallel", "parallel"),
            vmem_limit_bytes=int(budget),
        ),
    )(inputs, mask, halo, w_tap, b2)
    return out


def _reference(inputs, mask, weight, bias):
    # Pure-JAX reference matching the PyTorch module exactly (f32, highest precision).
    x = inputs * mask                       # (B, L, C_in)
    x = jnp.transpose(x, (0, 2, 1))         # (B, C_in, L)  == NCW
    y = lax.conv_general_dilated(
        x, weight, window_strides=(1,), padding=((PAD, PAD),),
        dimension_numbers=("NCH", "OIH", "NCH"),
        precision=lax.Precision.HIGHEST,
    ) + bias[None, :, None]
    y = jnp.maximum(y, 0.0)
    return jnp.transpose(y, (0, 2, 1))      # (B, L, C_out)


def _make_case(key, B, L, C_in, C_out):
    kx, km, kw, kb = jax.random.split(key, 4)
    inputs = jax.random.normal(kx, (B, L, C_in), dtype=jnp.float32)
    # binary padding-style mask, broadcast over channels (like the PyTorch mul)
    mask = (jax.random.uniform(km, (B, L, 1)) > 0.2).astype(jnp.float32)
    # PyTorch Conv1d default init: U(-b, b), b = 1/sqrt(fan_in)
    bound = 1.0 / math.sqrt(C_in * K)
    weight = jax.random.uniform(kw, (C_out, C_in, K), minval=-bound, maxval=bound,
                                dtype=jnp.float32)
    bias = jax.random.uniform(kb, (C_out,), minval=-bound, maxval=bound,
                              dtype=jnp.float32)
    return inputs, mask, weight, bias


if __name__ == "__main__":
    key = jax.random.PRNGKey(0)
    k1, k2, k3 = jax.random.split(key, 3)

    # Case 1: lane-dense channels (multiples of 128), bf16 MXU operands, two
    # sequence tiles per batch element -> exercises the merged-halo path. grid=(2,2).
    inputs, mask, weight, bias = _make_case(k1, 2, 512, 128, 128)
    out = masked_cnn_forward(inputs, mask, weight, bias,
                             use_bf16=True, max_seq_tile=256)
    out = jax.block_until_ready(out)
    ref = _reference(inputs, mask, weight, bias)
    assert out.shape == ref.shape
    assert jnp.allclose(out, ref, atol=3e-2, rtol=3e-2), "mismatch (bf16 / halo path)"

    # Case 2: L=300 not divisible by the tile -> cdiv grid with a zero-masked
    # tail tile (grid=(2,3), remainder 44 rows), f32 MXU path.
    inputs, mask, weight, bias = _make_case(k2, 2, 300, 64, 64)
    out = masked_cnn_forward(inputs, mask, weight, bias,
                             use_bf16=False, max_seq_tile=128)
    out = jax.block_until_ready(out)
    ref = _reference(inputs, mask, weight, bias)
    assert out.shape == ref.shape
    assert jnp.allclose(out, ref, atol=2e-2, rtol=2e-2), "mismatch (f32 / tail path)"

    # Case 3: tiny module-default-ish shapes, automatic tile selection.
    inputs, mask, weight, bias = _make_case(k3, 2, 16, 8, 16)
    out = masked_cnn_forward(inputs, mask, weight, bias, use_bf16=False)
    out = jax.block_until_ready(out)
    ref = _reference(inputs, mask, weight, bias)
    assert out.shape == ref.shape
    assert jnp.allclose(out, ref, atol=2e-2, rtol=2e-2), "mismatch (tiny path)"

    print("KERNEL_OK")
</pallas_src>

<mosaic_0001>
module attributes {stable_mosaic.version = 11 : i64} {
  func.func @_masked_conv_kernel(%arg0: i32, %arg1: i32, %arg2: memref<1x256x128xf32, #tpu.memory_space<vmem>>, %arg3: memref<1x256x1xf32, #tpu.memory_space<vmem>>, %arg4: memref<1x1x2x128xf32, #tpu.memory_space<vmem>>, %arg5: memref<3x128x128xbf16, #tpu.memory_space<vmem>>, %arg6: memref<1x128xf32, #tpu.memory_space<vmem>>, %arg7: memref<1x256x128xf32, #tpu.memory_space<vmem>>) attributes {dimension_semantics = [#tpu.dimension_semantics<parallel>, #tpu.dimension_semantics<parallel>], iteration_bounds = array<i64: 2, 2>, scalar_prefetch = 0 : i64, scratch_operands = 0 : i64, tpu.core_type = #tpu.core_type<tc>, window_params = [{transform_indices = @transform_0, window_bounds = array<i64: 1, 256, 128>}, {transform_indices = @transform_1, window_bounds = array<i64: 1, 256, 1>}, {transform_indices = @transform_2, window_bounds = array<i64: 1, 1, 2, 128>}, {pipeline_mode = #tpu.pipeline_mode<synchronous>, transform_indices = @transform_3, window_bounds = array<i64: 3, 128, 128>}, {pipeline_mode = #tpu.pipeline_mode<synchronous>, transform_indices = @transform_4, window_bounds = array<i64: 1, 128>}, {transform_indices = @transform_5, window_bounds = array<i64: 1, 256, 128>}]} {
    %c0 = arith.constant 0 : index
    %c0_0 = arith.constant 0 : index
    %c0_1 = arith.constant 0 : index
    %0 = vector.load %arg2[%c0, %c0_0, %c0_1] : memref<1x256x128xf32, #tpu.memory_space<vmem>>, vector<1x256x128xf32>
    %1 = vector.shape_cast %0 : vector<1x256x128xf32> to vector<256x128xf32>
    %c0_2 = arith.constant 0 : index
    %c0_3 = arith.constant 0 : index
    %c0_4 = arith.constant 0 : index
    %2 = vector.load %arg3[%c0_2, %c0_3, %c0_4] : memref<1x256x1xf32, #tpu.memory_space<vmem>>, vector<1x256x1xf32>
    %3 = vector.shape_cast %2 : vector<1x256x1xf32> to vector<256x1xf32>
    %4 = vector.broadcast %3 : vector<256x1xf32> to vector<256x128xf32>
    %5 = arith.mulf %1, %4 : vector<256x128xf32>
    %6 = tpu.iota {dimensions = array<i32: 0>} : vector<256x1xi32>
    %c0_5 = arith.constant 0 : index
    %c0_6 = arith.constant 0 : index
    %c0_7 = arith.constant 0 : index
    %c0_8 = arith.constant 0 : index
    %7 = vector.load %arg4[%c0_5, %c0_6, %c0_7, %c0_8] : memref<1x1x2x128xf32, #tpu.memory_space<vmem>>, vector<1x1x2x128xf32>
    %8 = vector.shape_cast %7 : vector<1x1x2x128xf32> to vector<2x128xf32>
    %9 = vector.extract_strided_slice %8 {offsets = [0, 0], sizes = [1, 128], strides = [1, 1]} : vector<2x128xf32> to vector<1x128xf32>
    %10 = vector.extract_strided_slice %8 {offsets = [1, 0], sizes = [1, 128], strides = [1, 1]} : vector<2x128xf32> to vector<1x128xf32>
    %c0_i32 = arith.constant 0 : i32
    %11 = vector.broadcast %c0_i32 : i32 to vector<256x1xi32>
    %12 = arith.cmpi eq, %6, %11 : vector<256x1xi32>
    %c1_i32 = arith.constant 1 : i32
    %13 = tpu.dynamic_rotate %5 by %c1_i32 dim 0 : vector<256x128xf32>, i32 -> vector<256x128xf32>
    %14 = vector.shape_cast %12 : vector<256x1xi1> to vector<256x1xi1>
    %15 = vector.broadcast %14 : vector<256x1xi1> to vector<256x128xi1>
    %16 = vector.shape_cast %9 : vector<1x128xf32> to vector<1x128xf32>
    %17 = vector.broadcast %16 : vector<1x128xf32> to vector<256x128xf32>
    %18 = arith.select %15, %17, %13 : vector<256x128xi1>, vector<256x128xf32>
    %c255_i32 = arith.constant 255 : i32
    %19 = vector.broadcast %c255_i32 : i32 to vector<256x1xi32>
    %20 = arith.cmpi eq, %6, %19 : vector<256x1xi32>
    %c255_i32_9 = arith.constant 255 : i32
    %21 = tpu.dynamic_rotate %5 by %c255_i32_9 dim 0 : vector<256x128xf32>, i32 -> vector<256x128xf32>
    %22 = vector.shape_cast %20 : vector<256x1xi1> to vector<256x1xi1>
    %23 = vector.broadcast %22 : vector<256x1xi1> to vector<256x128xi1>
    %24 = vector.shape_cast %10 : vector<1x128xf32> to vector<1x128xf32>
    %25 = vector.broadcast %24 : vector<1x128xf32> to vector<256x128xf32>
    %26 = arith.select %23, %25, %21 : vector<256x128xi1>, vector<256x128xf32>
    %27 = arith.truncf %18 : vector<256x128xf32> to vector<256x128xbf16>
    %c0_10 = arith.constant 0 : index
    %c0_11 = arith.constant 0 : index
    %c0_12 = arith.constant 0 : index
    %28 = vector.load %arg5[%c0_10, %c0_11, %c0_12] : memref<3x128x128xbf16, #tpu.memory_space<vmem>>, vector<1x128x128xbf16>
    %29 = vector.shape_cast %28 : vector<1x128x128xbf16> to vector<128x128xbf16>
    %cst = arith.constant dense<0.000000e+00> : vector<256x128xf32>
    %30 = tpu.matmul %27, %29, %cst {dimension_numbers = #tpu.dot_dimension_numbers<[1], [0], [0], [1], [0, 0, 1, 1], [], []>} : vector<256x128xbf16>, vector<128x128xbf16>, vector<256x128xf32> -> vector<256x128xf32>
    %31 = arith.truncf %5 : vector<256x128xf32> to vector<256x128xbf16>
    %c1 = arith.constant 1 : index
    %c0_13 = arith.constant 0 : index
    %c0_14 = arith.constant 0 : index
    %32 = vector.load %arg5[%c1, %c0_13, %c0_14] : memref<3x128x128xbf16, #tpu.memory_space<vmem>>, vector<1x128x128xbf16>
    %33 = vector.shape_cast %32 : vector<1x128x128xbf16> to vector<128x128xbf16>
    %cst_15 = arith.constant dense<0.000000e+00> : vector<256x128xf32>
    %34 = tpu.matmul %31, %33, %cst_15 {dimension_numbers = #tpu.dot_dimension_numbers<[1], [0], [0], [1], [0, 0, 1, 1], [], []>} : vector<256x128xbf16>, vector<128x128xbf16>, vector<256x128xf32> -> vector<256x128xf32>
    %35 = arith.addf %30, %34 : vector<256x128xf32>
    %36 = arith.truncf %26 : vector<256x128xf32> to vector<256x128xbf16>
    %c2 = arith.constant 2 : index
    %c0_16 = arith.constant 0 : index
    %c0_17 = arith.constant 0 : index
    %37 = vector.load %arg5[%c2, %c0_16, %c0_17] : memref<3x128x128xbf16, #tpu.memory_space<vmem>>, vector<1x128x128xbf16>
    %38 = vector.shape_cast %37 : vector<1x128x128xbf16> to vector<128x128xbf16>
    %cst_18 = arith.constant dense<0.000000e+00> : vector<256x128xf32>
    %39 = tpu.matmul %36, %38, %cst_18 {dimension_numbers = #tpu.dot_dimension_numbers<[1], [0], [0], [1], [0, 0, 1, 1], [], []>} : vector<256x128xbf16>, vector<128x128xbf16>, vector<256x128xf32> -> vector<256x128xf32>
    %40 = arith.addf %35, %39 : vector<256x128xf32>
    %c0_19 = arith.constant 0 : index
    %c0_20 = arith.constant 0 : index
    %41 = vector.load %arg6[%c0_19, %c0_20] : memref<1x128xf32, #tpu.memory_space<vmem>>, vector<1x128xf32>
    %42 = vector.broadcast %41 : vector<1x128xf32> to vector<256x128xf32>
    %43 = arith.addf %40, %42 : vector<256x128xf32>
    %cst_21 = arith.constant 0.000000e+00 : f32
    %44 = vector.broadcast %cst_21 : f32 to vector<256x128xf32>
    %45 = arith.maximumf %43, %44 : vector<256x128xf32>
    %c0_22 = arith.constant 0 : index
    %c0_23 = arith.constant 0 : index
    %c0_24 = arith.constant 0 : index
    %46 = vector.load %arg7[%c0_22, %c0_23, %c0_24] : memref<1x256x128xf32, #tpu.memory_space<vmem>>, vector<1x256x128xf32>
    %47 = vector.shape_cast %46 : vector<1x256x128xf32> to vector<256x128xf32>
    %48 = vector.shape_cast %45 : vector<256x128xf32> to vector<1x256x128xf32>
    tpu.vector_store %arg7[%c0_22, %c0_23, %c0_24], %48 {strides = array<i32>} : memref<1x256x128xf32, #tpu.memory_space<vmem>>, vector<1x256x128xf32>,
    return
  }
  func.func @transform_0(%arg0: i32, %arg1: i32) -> (i32, i32, i32) {
    %c0_i32 = arith.constant 0 : i32
    %c0_i32_0 = arith.constant 0 : i32
    return %arg0, %arg1, %c0_i32 : i32, i32, i32
  }
  func.func @transform_1(%arg0: i32, %arg1: i32) -> (i32, i32, i32) {
    %c0_i32 = arith.constant 0 : i32
    %c0_i32_0 = arith.constant 0 : i32
    return %arg0, %arg1, %c0_i32 : i32, i32, i32
  }
  func.func @transform_2(%arg0: i32, %arg1: i32) -> (i32, i32, i32, i32) {
    %c0_i32 = arith.constant 0 : i32
    %c0_i32_0 = arith.constant 0 : i32
    %c0_i32_1 = arith.constant 0 : i32
    return %arg0, %arg1, %c0_i32, %c0_i32_0 : i32, i32, i32, i32
  }
  func.func @transform_3(%arg0: i32, %arg1: i32) -> (i32, i32, i32) {
    %c0_i32 = arith.constant 0 : i32
    %c0_i32_0 = arith.constant 0 : i32
    %c0_i32_1 = arith.constant 0 : i32
    %c0_i32_2 = arith.constant 0 : i32
    return %c0_i32, %c0_i32_0, %c0_i32_1 : i32, i32, i32
  }
  func.func @transform_4(%arg0: i32, %arg1: i32) -> (i32, i32) {
    %c0_i32 = arith.constant 0 : i32
    %c0_i32_0 = arith.constant 0 : i32
    %c0_i32_1 = arith.constant 0 : i32
    return %c0_i32, %c0_i32_0 : i32, i32
  }
  func.func @transform_5(%arg0: i32, %arg1: i32) -> (i32, i32, i32) {
    %c0_i32 = arith.constant 0 : i32
    %c0_i32_0 = arith.constant 0 : i32
    return %arg0, %arg1, %c0_i32 : i32, i32, i32
  }
}

</mosaic_0001>

<bundles_post_ra>
// kernel: tpu_custom_call.1
= control target key start
LH: loop header
LB: loop body
LE: loop exit
PB: predicated region body
PF: predicated region fallthrough
CT: control target
= control target key end

     0   :  { %10 = vsyncpa [#allocation3], 0  ;;  %s3434_s0 = inlined_call_operand.vmem [shape: f32[2,512,128], index: 0, kind: input, shape index: {}]   ;;  %s3435_s1 = inlined_call_operand.vmem [shape: f32[2,512,1], index: 1, kind: input, shape index: {}]   ;;  %s3436_s2 = inlined_call_operand.vmem [shape: f32[2,2,2,128], index: 2, kind: input, shape index: {}]   ;;  %s3437_s3 = inlined_call_operand.hbm [shape: bf16[3,128,128], index: 3, kind: input, shape index: {}]   ;;  %s3438_s4 = inlined_call_operand.vmem [shape: f32[1,128], index: 4, kind: input, shape index: {}]   ;;  %s3439_s5 = inlined_call_operand.hbm [shape: f32[2,512,128], index: 5, kind: output, shape index: {}]  }
   0x1   :  { %11 = vsyncpa [#allocation4], 0 }
   0x2   :  { %13 = vsyncpa [#allocation4 + $0x1], 0  ;;  %s2648_s18 = smov 0   ;;  %s2650_s19 = smov 0  }
   0x3   :  { %s2652_s20 = smov 0   ;;  %s2654_s21 = smov 0  }
   0x4   :  { %s2656_s22 = smov 0   ;;  %s2658_s23 = smov 0  }
   0x5   :  { %s2660_s24 = smov 0   ;;  %s2662_s25 = smov 0  }
   0x6 LB: > { %s2027_s26 = sadd.s32 4294967295, %s2609_s25   ;;  %s2028_s27 = sadd.s32 4294967294, %s2609_s25   ;;  %s2609_s25 = sphi %s2662_s25, %s19_s25   ;;  %s2605_s24 = sphi %s2660_s24, %s3459_s24   ;;  %s2601_s23 = sphi %s2658_s23, %s3458_s23   ;;  %s2597_s22 = sphi %s2656_s22, %s3457_s22   ;;  %s2593_s21 = sphi %s2654_s21, %s3456_s21   ;;  %s2589_s20 = sphi %s2652_s20, %s3455_s20   ;;  %s2585_s19 = sphi %s2650_s19, %s3454_s19   ;;  %s2581_s18 = sphi %s2648_s18, %s3453_s18  }
   0x7   : > { %s28_s28 = sadd.s32 1, %s2601_s23  ;;  %s31_s29 = sadd.s32 1, %s2605_s24 }
   0x8   : > { %p29_p0 = scmp.ge.s32.totalorder %s28_s28, 2  ;;  %s166_s30 = sadd.s32 1, %s2589_s20 }
   0x9   : > { %p176_p1 = scmp.ne.s32.totalorder %s2589_s20, %s2585_s19  ;;  %p177_p2 = scmp.eq.s32.totalorder %s2027_s26, 3 }
   0xa   : > { %s3461_s28 = smov (%p29_p0, %s28_s28), 0  ;;  %s3463_s29 = smov (!%p29_p0, %s31_s29), %s2605_s24 }
   0xb   : > { %s162_s6 = ssub.s32 %s2601_s23, %s3461_s28  ;;  %p2700_p3 = por %p177_p2, %p176_p1 }
   0xc   : > { %p33_p4 = scmp.ge.s32.totalorder %s3463_s29, 2  ;;  %p182_p5 = scmp.ne.s32.totalorder %s2585_s19, %s2581_s18 }
   0xd   : > { %s3444_s7 = scalar_select %p2700_p3, 1, 0 }
   0xe   : > { %p183_p6 = scmp.eq.s32.totalorder %s2028_s27, 3  ;;  %p2029_p7 = scmp.ge.s32.totalorder %s2609_s25, 1 }
   0xf   : > { %s3465_s29 = smov (%p33_p4, %s3463_s29), 0  ;;  %p190_p9 = scmp.lt.s32.totalorder %s2609_s25, 5 }
  0x10   : > { %p2709_p8 = por %p183_p6, %p182_p5  ;;  %s161_s9 = ssub.s32 %s2605_s24, %s3465_s29 }
  0x11   : > { %s163_s10 = sor.u32 %s162_s6, %s161_s9  ;;  %p2716_p10 = pnand %p2029_p7, %p190_p9 }
  0x12   : > { %s3445_s8 = scalar_select %p2709_p8, 1, 0 }
  0x13   : > { %s3446_s11 = scalar_select %p2716_p10, 1, 0 }
  0x14   : > { %p164_p11 = scmp.eq.s32.totalorder %s163_s10, 0  ;;  %p2720_p12 = scmp.eq.s32.totalorder %s2027_s26, 0 }
  0x15   : > { %p2376_p13 = pneg %p2716_p10  ;;  %s2611_s14 = smov [#allocation2]  }
  0x16   : > { %s3447_s12 = scalar_select %p2720_p12, 1, 0 }
  0x17   : > { %s2727_s13 = scalar_select %p164_p11, %s2589_s20, %s166_s30  }
  0x18   : > { %s202_s15 = sshll.u32 %s2611_s14, 4  ;;  %p2731_p0 = pnand %p2720_p12, %p2376_p13  ;;  %s203_s15 = int_to_ptr.vmem [resolvable:$true] %s202_s15 }
  0x19   : > { %s2483_s26 = scalar_lea.hbm %s3437_s3, 3072 }
  0x1a   : > { %p2484_p1 = scmp.ne.s32.totalorder %s3437_s3, %s2483_s26  ;;  %p2485_p2 = pneg %p2731_p0 }
  0x1b   : > { %p2490_p6 = scmp.lt.u32.totalorder %s2483_s26, %s3437_s3 }
  0x1c   : > { %p2486_p4 = pnand %p2485_p2, %p2484_p1 }
  0x1e   : > { %p2487_p5 = pneg %p2486_p4 }
  0x20   : > { %p2492_p7 = pnand %p2490_p6, %p2487_p5 }
  0x22   : > { %2495 = shalt.err (!%p2492_p7)
}
  0x23   : > { %s2496_s14 = scalar_lea.vmem %s203_s15, 3072  ;;  %p2504_p8 = scmp.lt.s32.totalorder %s203_s15, %s203_s15 }
  0x24   : > { %p2497_p9 = scmp.ne.s32.totalorder %s203_s15, %s2496_s14  ;;  %p2505_p3 = scmp.lt.s32.totalorder %s2496_s14, %s2496_s14 }
  0x26   : > { %p2499_p11 = pnand %p2497_p9, %p2485_p2  ;;  %p2506_p12 = por %p2505_p3, %p2504_p8 }
  0x28   : > { %p2500_p13 = pneg %p2499_p11 }
  0x2a   : > { %p2507_p10 = pnand %p2506_p12, %p2500_p13 }
  0x2c   : > { %2510 = shalt.err (!%p2507_p10)
}
  0x2d   : > { %s2612_s17 = smov 64   ;;  %s2613_s27 = smov 4  }
  0x2e   : > { %2379 = dma.hbm_to_vmem [thread:$0]  (!%p2731_p0), %s3437_s3, 3072, %s203_s15, [#allocation3], %s2612_s17, %s2612_s17, %s2613_s27  }
  0x2f   : > { %p3449_p1 = scmp.ne.s32.totalorder %s3446_s11, 0 }
  0x30   : > { %p3450_p4 = scmp.ne.s32.totalorder (!%p3449_p1), %s3447_s12, 0 }
  0x31   : > { %258 = sbr.rel (%p3449_p1) target bundleno = 534 (0x216), region = 40 }
  0x38   : > { %2572 = dma.done.wait (%p3450_p4), [#allocation3], 3072  }
  0x39   : > { %2574 = vsyncadd (%p3450_p4), [#allocation3], 4294964224  ;;  %s2758_s26 = sshll.u32 %s2593_s21, 5  ;;  %p308_p3 = scmp.lt.s32.totalorder %s2597_s22, 1  ;;  %v2614_v0 = vmov 0   ;;  %v2459_v1 = vld [vmem:[#allocation2 + $0x40] sm:$0xff]   ;;  %v593_v21 = vlaneseq }
  0x3a   : > { %2458 = vset.pattern.permute.xlu1 %v2614_v0  ;;  %2457 = vset.pattern.permute.xlu0 %v2614_v0  ;;  %p310_p8 = scmp.lt.s32.totalorder %s2758_s26, 63  ;;  %v2785_v10 = vld [vmem:[#allocation2] sm:$0xff]   ;;  %p329_p10 = scmp.lt.s32.totalorder %s2593_s21, 1  ;;  %v2461_v13 = vld [vmem:[#allocation2 + $0x48] sm:$0xff]   ;;  %v2463_v15 = vld [vmem:[#allocation2 + $0x50] sm:$0xff]  }
  0x3b   : > { %s2763_s11 = scalar_select %p308_p3, %s2597_s22, 1  ;;  %2146 = vmatprep.subr.bf16.mxu1 %v2459_v1  ;;  %v2790_v14 = vld [vmem:[#allocation2 + $0x8] sm:$0xff]   ;;  %2194 = vmatprep.subr.bf16.mxu0 %v2785_v10  ;;  %v2794_v16 = vld [vmem:[#allocation2 + $0x10] sm:$0xff]   ;;  %v2465_v17 = vld [vmem:[#allocation2 + $0x58] sm:$0xff]   ;;  %v2810_v26 = vshrl.u32 %v593_v21, 7 }
  0x3c   : > { %s311_s15 = scalar_select %p310_p8, %s2758_s26, 63  ;;  %2147 = vmatpush3.bf16.msra.mxu1 %v2459_v1  ;;  %2195 = vmatpush3.bf16.msra.mxu0 %v2785_v10  ;;  %v2802_v20 = vld [vmem:[#allocation2 + $0x18] sm:$0xff]   ;;  %v2467_v22 = vld [vmem:[#allocation2 + $0x60] sm:$0xff]   ;;  %v2469_v27 = vld [vmem:[#allocation2 + $0x68] sm:$0xff]  }
  0x3d   : > { %s2036_s16 = sshll.u32 %s2763_s11, 6  ;;  %2148 = vmatprep.subr.bf16.mxu1 %v2461_v13  ;;  %s3467_s21 = smov (!%p329_p10, %s2593_s21), 1  ;;  %2196 = vmatprep.subr.bf16.mxu0 %v2790_v14  ;;  %v2808_v25 = vld [vmem:[#allocation2 + $0x20] sm:$0xff]   ;;  %v987_v29 = vsub.s32 1, %v2810_v26  ;;  %v2820_v31 = vld [vmem:[#allocation2 + $0x28] sm:$0xff]   ;;  %v2471_v32 = vld [vmem:[#allocation2 + $0x70] sm:$0xff]  }
  0x3e   : > { %s2767_s30 = sadd.s32 %s2036_s16, %s311_s15  ;;  %s2041_s27 = sshll.u32 %s2763_s11, 1  ;;  %v2831_v37 = vld [vmem:[#allocation2 + $0x30] sm:$0xff]   ;;  %v2473_v38 = vld [vmem:[#allocation2 + $0x78] sm:$0xff]   ;;  %v2845_v44 = vld [vmem:[#allocation2 + $0x80] sm:$0xff]   ;;  %v790_v62 = vsub.s32 0, %v2810_v26  ;;  %vm627_vm0 = vcmp.eq.s32.totalorder %v2810_v26, 0 }
  0x3f   : > { %s2037_s12 = sshll.u32 %s2767_s30, 3  ;;  %s332_s6 = sadd.s32 %s2041_s27, %s3467_s21  ;;  %v2838_v41 = vld [vmem:[#allocation2 + $0x38] sm:$0xff]   ;;  %vm888_vm1 = vcmp.lt.s32.totalorder %v2810_v26, 7  ;;  %vm691_vm2 = vcmp.lt.s32.totalorder %v2810_v26, 1 }
  0x40   : > { %s2775_s17 = scalar_lea.vmem %s3435_s1, %s2037_s12  ;;  %2149 = vmatpush3.bf16.msra.mxu1 %v2461_v13  ;;  %2197 = vmatpush3.bf16.msra.mxu0 %v2790_v14  ;;  %s2042_s9 = sshll.u32 %s332_s6, 1 }
  0x41   : > { %v370_v2 = vld [vmem:[%s2775_s17 + $0x8] sm:$0xff]  ;;  %v369_v3 = vld [vmem:[%s2775_s17] sm:$0xff]  ;;  %v371_v4 = vld [vmem:[%s2775_s17 + $0x10] sm:$0xff]  ;;  %2150 = vmatprep.subr.bf16.mxu1 %v2463_v15  ;;  %2198 = vmatprep.subr.bf16.mxu0 %v2794_v16  ;;  %s334_s15 = scalar_lea.vmem %s3436_s2, %s2042_s9  ;;  %s2864_s14 = scalar_lea.vmem %s3434_s0, %s2037_s12 }
  0x42   : > { %408 = vperm.xlu1 %2458, %v370_v2   ;;  %403 = vperm.xlu0 %2457, %v369_v3   ;;  %v400_v5 = vld [vmem:[%s2775_s17 + $0xf8] sm:$0xff]  ;;  %v373_v6 = vld [vmem:[%s2775_s17 + $0x20] sm:$0xff]  ;;  %v375_v8 = vld [vmem:[%s2775_s17 + $0x30] sm:$0xff]  ;;  %s304_s30 = sand.u32 1, %s2585_s19   ;;  %s2070_s9 = sshll.u32 %s2597_s22, 6 }
  0x43   : > { %v372_v7 = vld [vmem:[%s2775_s17 + $0x18] sm:$0xff]  ;;  %v374_v9 = vld [vmem:[%s2775_s17 + $0x28] sm:$0xff]  ;;  %v377_v11 = vld [vmem:[%s2775_s17 + $0x40] sm:$0xff]  ;;  %s2034_s27 = sshll.u32 %s304_s30, 8  ;;  %s1894_s21 = sadd.s32 %s2070_s9, %s2758_s26 }
  0x44   : > { %v376_v12 = vld [vmem:[%s2775_s17 + $0x38] sm:$0xff]  ;;  %v379_v18 = vld [vmem:[%s2775_s17 + $0x50] sm:$0xff]  ;;  %v378_v19 = vld [vmem:[%s2775_s17 + $0x48] sm:$0xff]  ;;  %2151 = vmatpush3.bf16.msra.mxu1 %v2463_v15  ;;  %2199 = vmatpush3.bf16.msra.mxu0 %v2794_v16  ;;  %s3304_s6 = scalar_lea.vmem [#allocation5], %s2034_s27  ;;  %s2071_s22 = sshll.u32 %s1894_s21, 7 }
  0x45   : > { %2152 = vmatprep.subr.bf16.mxu1 %v2465_v17  ;;  %v381_v23 = vld [vmem:[%s2775_s17 + $0x60] sm:$0xff]  ;;  %v380_v24 = vld [vmem:[%s2775_s17 + $0x58] sm:$0xff]  ;;  %2200 = vmatprep.subr.bf16.mxu0 %v2802_v20  ;;  %v383_v28 = vld [vmem:[%s2775_s17 + $0x70] sm:$0xff]  ;;  %s1897_s26 = sshll.u32 %s3304_s6, 4  ;;  %s3371_s16 = scalar_lea.hbm %s3439_s5, %s2071_s22  ;;  %s3375_s26 = int_to_ptr.vmem [resolvable:$true] %s1897_s26 }
  0x46   : > { %413 = vperm.xlu1 %2458, %v371_v4   ;;  %558 = vperm.xlu0 %2457, %v400_v5   ;;  %v382_v30 = vld [vmem:[%s2775_s17 + $0x68] sm:$0xff]  ;;  %v2823_v33 = vld [vmem:[%s334_s15] sm:$0x3]  ;;  %v384_v36 = vld [vmem:[%s2775_s17 + $0x78] sm:$0xff]  ;;  %v625_v4 = vadd.s32 248, %v2810_v26  ;;  %s3382_s10 = scalar_lea.sflag [#allocation4], %s304_s30 }
  0x47   : > { %v385_v34 = vld [vmem:[%s2775_s17 + $0x80] sm:$0xff]  ;;  %v2827_v35 = vrot.slane %v2823_v33, %v987_v29  ;;  %v387_v39 = vld [vmem:[%s2775_s17 + $0x90] sm:$0xff]  ;;  %v386_v40 = vld [vmem:[%s2775_s17 + $0x88] sm:$0xff]  ;;  %p3451_p0 = scmp.ne.s32.totalorder %s3444_s7, 0  ;;  %s2615_s12 = smov [#allocation5]  }
  0x48   : > { %2153 = vmatpush3.bf16.msra.mxu1 %v2465_v17  ;;  %2201 = vmatpush3.bf16.msra.mxu0 %v2802_v20  ;;  %v389_v42 = vld [vmem:[%s2775_s17 + $0xa0] sm:$0xff]  ;;  %v388_v43 = vld [vmem:[%s2775_s17 + $0x98] sm:$0xff]  ;;  %v391_v45 = vld [vmem:[%s2775_s17 + $0xb0] sm:$0xff]  ;;  %vm855_vm3 = vcmp.eq.s32.totalorder %v625_v4, 255 }
  0x49   : > { %2154 = vmatprep.subr.bf16.mxu1 %v2467_v22  ;;  %2202 = vmatprep.subr.bf16.mxu0 %v2808_v25  ;;  %v390_v46 = vld [vmem:[%s2775_s17 + $0xa8] sm:$0xff]  ;;  %v393_v47 = vld [vmem:[%s2775_s17 + $0xc0] sm:$0xff]  ;;  %v392_v48 = vld [vmem:[%s2775_s17 + $0xb8] sm:$0xff] }
  0x4a   : > { %423 = vperm.xlu1 %2458, %v373_v6   ;;  %418 = vperm.xlu0 %2457, %v372_v7   ;;  %v395_v49 = vld [vmem:[%s2775_s17 + $0xd0] sm:$0xff]  ;;  %v394_v50 = vld [vmem:[%s2775_s17 + $0xc8] sm:$0xff]  ;;  %v397_v51 = vld [vmem:[%s2775_s17 + $0xe0] sm:$0xff] }
  0x4b   : > { %v396_v52 = vld [vmem:[%s2775_s17 + $0xd8] sm:$0xff]  ;;  %v399_v53 = vld [vmem:[%s2775_s17 + $0xf0] sm:$0xff]  ;;  %v398_v54 = vld [vmem:[%s2775_s17 + $0xe8] sm:$0xff]  ;;  %s2515_s17 = sshll.u32 %s2615_s12, 4  ;;  %s2516_s17 = int_to_ptr.vmem [resolvable:$false] %s2515_s17 }
  0x4c   : > { %2155 = vmatpush3.bf16.msra.mxu1 %v2467_v22  ;;  %2203 = vmatpush3.bf16.msra.mxu0 %v2808_v25  ;;  %v338_v55 = vld [vmem:[%s2864_s14 + $0x8] sm:$0xff]  ;;  %v337_v56 = vld [vmem:[%s2864_s14] sm:$0xff]  ;;  %v368_v61 = vld [vmem:[%s2864_s14 + $0xf8] sm:$0xff]  ;;  %s2517_s27 = scalar_lea.vmem %s2516_s17, 8192  ;;  %p2518_p6 = scmp.lt.s32.totalorder %s3375_s26, %s2516_s17 }
  0x4d   : > { %2156 = vmatprep.subr.bf16.mxu1 %v2469_v27  ;;  %2204 = vmatprep.subr.bf16.mxu0 %v2820_v31  ;;  %v339_v0 = vld [vmem:[%s2864_s14 + $0x10] sm:$0xff]  ;;  %v341_v6 = vld [vmem:[%s2864_s14 + $0x20] sm:$0xff]  ;;  %v340_v7 = vld [vmem:[%s2864_s14 + $0x18] sm:$0xff] }
  0x4e   : > { %433 = vperm.xlu1 %2458, %v375_v8   ;;  %428 = vperm.xlu0 %2457, %v374_v9   ;;  %v791_v8 = vrot.slane %v2823_v33, %v790_v62  ;;  %v2477_v4 = vld [vmem:[#allocation2 + $0x90] sm:$0xff]  }
  0x50   : > { %2157 = vmatpush3.bf16.msra.mxu1 %v2469_v27  ;;  %2205 = vmatpush3.bf16.msra.mxu0 %v2820_v31 }
  0x51   : > { %2158 = vmatprep.subr.bf16.mxu1 %v2471_v32  ;;  %2206 = vmatprep.subr.bf16.mxu0 %v2831_v37 }
  0x52   : > { %443 = vperm.xlu1 %2458, %v377_v11   ;;  %438 = vperm.xlu0 %2457, %v376_v12  }
  0x54   : > { %2159 = vmatpush3.bf16.msra.mxu1 %v2471_v32  ;;  %2207 = vmatpush3.bf16.msra.mxu0 %v2831_v37 }
  0x55   : > { %2160 = vmatprep.subr.bf16.mxu1 %v2473_v38  ;;  %2208 = vmatprep.subr.bf16.mxu0 %v2838_v41 }
  0x56   : > { %453 = vperm.xlu1 %2458, %v379_v18   ;;  %448 = vperm.xlu0 %2457, %v378_v19  }
  0x58   : > { %2161 = vmatpush3.bf16.msra.mxu1 %v2473_v38  ;;  %2209 = vmatpush3.bf16.msra.mxu0 %v2838_v41 }
  0x59   : > { %2290 = vmatprep.subr.bf16.mxu1 %v2785_v10  ;;  %2242 = vmatprep.subr.bf16.mxu0 %v2845_v44 }
  0x5a   : > { %463 = vperm.xlu1 %2458, %v381_v23   ;;  %458 = vperm.xlu0 %2457, %v380_v24   ;;  %v343_v23 = vld [vmem:[%s2864_s14 + $0x30] sm:$0xff]  ;;  %v342_v24 = vld [vmem:[%s2864_s14 + $0x28] sm:$0xff] }
  0x5e   : > { %473 = vperm.xlu1 %2458, %v383_v28   ;;  %468 = vperm.xlu0 %2457, %v382_v30  }
  0x62   : > { %483 = vperm.xlu1 %2458, %v385_v34   ;;  %478 = vperm.xlu0 %2457, %v384_v36  }
  0x66   : > { %493 = vperm.xlu1 %2458, %v387_v39   ;;  %488 = vperm.xlu0 %2457, %v386_v40  }
  0x6a   : > { %503 = vperm.xlu1 %2458, %v389_v42   ;;  %498 = vperm.xlu0 %2457, %v388_v43  }
  0x6e   : > { %513 = vperm.xlu1 %2458, %v391_v45   ;;  %508 = vperm.xlu0 %2457, %v390_v46   ;;  %v345_v45 = vld [vmem:[%s2864_s14 + $0x40] sm:$0xff]  ;;  %v344_v46 = vld [vmem:[%s2864_s14 + $0x38] sm:$0xff] }
  0x72   : > { %523 = vperm.xlu1 %2458, %v393_v47   ;;  %518 = vperm.xlu0 %2457, %v392_v48  }
  0x76   : > { %533 = vperm.xlu1 %2458, %v395_v49   ;;  %528 = vperm.xlu0 %2457, %v394_v50  }
  0x7a   : > { %543 = vperm.xlu1 %2458, %v397_v51   ;;  %538 = vperm.xlu0 %2457, %v396_v52  }
  0x7e   : > { %553 = vperm.xlu1 %2458, %v399_v53   ;;  %548 = vperm.xlu0 %2457, %v398_v54   ;;  %v2476_v54 = vld [vmem:[#allocation2 + $0x88] sm:$0xff]  }
  0xc1   : > { %v409_v57 = vpop.permute.xlu1 %408  ;;  %v404_v58 = vpop.permute.xlu0 %403 }
  0xc2   : > { %v2868_v59 = vmul.f32 %v409_v57, %v338_v55  ;;  %v2870_v60 = vmul.f32 %v404_v58, %v337_v56  ;;  %v347_v58 = vld [vmem:[%s2864_s14 + $0x50] sm:$0xff] }
  0xc4   : > { %v1053_v2 = vpack.c.bf16 %v2868_v59, %v2870_v60  ;;  %v660_v5 = vrot.slane %v2868_v59, 7  ;;  %v659_v9 = vrot.slane %v2870_v60, 7  ;;  %v856_v15 = vrot.slane %v2870_v60, 1  ;;  %v359_v60 = vld [vmem:[%s2864_s14 + $0xb0] sm:$0xff] }
  0xc5   : > { %v414_v63 = vpop.permute.xlu1 %413  ;;  %v559_v1 = vpop.permute.xlu0 %558 }
  0xc6   : > { %v2877_v3 = vmul.f32 %v559_v1, %v368_v61  ;;  %2162 = vmatprep.mubr.bf16.mxu1 %v1053_v2  ;;  %v2886_v11 = vmul.f32 %v414_v63, %v339_v0  ;;  %v722_v32 = vsel %vm691_vm2, %v659_v9, %v660_v5  ;;  %v346_v61 = vld [vmem:[%s2864_s14 + $0x48] sm:$0xff] }
  0xc8   : > { %v690_v12 = vrot.slane %v2877_v3, 7  ;;  %v887_v13 = vrot.slane %v2877_v3, 1  ;;  %v661_v29 = vrot.slane %v2886_v11, 7 }
  0xc9   : > { %v424_v17 = vpop.permute.xlu1 %423  ;;  %v419_v18 = vpop.permute.xlu0 %418 }
  0xca   : > { %v2893_v19 = vmul.f32 %v424_v17, %v341_v6  ;;  %v2895_v21 = vmul.f32 %v419_v18, %v340_v7  ;;  %v723_v22 = vsel %vm691_vm2, %v690_v12, %v659_v9  ;;  %v920_v28 = vsel %vm888_vm1, %v887_v13, %v856_v15  ;;  %v348_v9 = vld [vmem:[%s2864_s14 + $0x58] sm:$0xff] }
  0xcb   : > { %v792_v27 = vsel %vm627_vm0, %v791_v8, %v723_v22  ;;  %v2918_v39 = vsel %vm855_vm3, %v2827_v35, %v920_v28  ;;  %v721_v35 = vsel %vm691_vm2, %v660_v5, %v661_v29  ;;  %v2478_v28 = vld [vmem:[#allocation2 + $0x98] sm:$0xff]  }
  0xcc   : > { %v662_v30 = vrot.slane %v2895_v21, 7  ;;  %v1054_v36 = vpack.c.bf16 %v2895_v21, %v2886_v11  ;;  %v1021_v38 = vpack.c.bf16 %v722_v32, %v792_v27  ;;  %v663_v40 = vrot.slane %v2893_v19, 7 }
  0xcd   : > { %v434_v33 = vpop.permute.xlu1 %433  ;;  %v429_v34 = vpop.permute.xlu0 %428 }
  0xce   : > { %v2921_v42 = vmul.f32 %v434_v33, %v343_v23  ;;  %v2923_v43 = vmul.f32 %v429_v34, %v342_v24  ;;  %2163 = vmatmul.mubr.bf16.vlgmr.msra.gmra.mrb[0].mxu1 %v1054_v36  ;;  %2210 = vmatprep.mubr.bf16.mxu0 %v1021_v38  ;;  %v720_v47 = vsel %vm691_vm2, %v661_v29, %v662_v30  ;;  %v351_v33 = vld [vmem:[%s2864_s14 + $0x70] sm:$0xff]  ;;  %v350_v34 = vld [vmem:[%s2864_s14 + $0x68] sm:$0xff] }
  0xcf   : > { %2298 = vmatpush3.bf16.msra.mxu1 %v2785_v10  ;;  %v1022_v52 = vpack.c.bf16 %v720_v47, %v721_v35  ;;  %v719_v57 = vsel %vm691_vm2, %v662_v30, %v663_v40  ;;  %v2479_v47 = vld [vmem:[#allocation2 + $0xa0] sm:$0xff]  }
  0xd0   : > { %v664_v48 = vrot.slane %v2923_v43, 7  ;;  %v665_v49 = vrot.slane %v2921_v42, 7  ;;  %v1055_v53 = vpack.c.bf16 %v2923_v43, %v2893_v19  ;;  %2291 = vmatprep.subr.bf16.mxu1 %v2790_v14 }
  0xd1   : > { %v444_v50 = vpop.permute.xlu1 %443  ;;  %v439_v51 = vpop.permute.xlu0 %438  ;;  %2211 = vmatmul.mubr.bf16.vlgmr.msra.gmra.mrb[0].mxu0 %v1022_v52 }
  0xd2   : > { %v2937_v55 = vmul.f32 %v444_v50, %v345_v45  ;;  %v2939_v56 = vmul.f32 %v439_v51, %v344_v46  ;;  %v718_v10 = vsel %vm691_vm2, %v663_v40, %v664_v48  ;;  %2166 = vmatprep.mubr.bf16.mxu1 %v1055_v53  ;;  %2243 = vmatpush3.bf16.msra.mxu0 %v2845_v44  ;;  %v349_v44 = vld [vmem:[%s2864_s14 + $0x60] sm:$0xff]  ;;  %v352_v51 = vld [vmem:[%s2864_s14 + $0x78] sm:$0xff] }
  0xd3   : > { %v1023_v62 = vpack.c.bf16 %v718_v10, %v719_v57  ;;  %2299 = vmatpush3.bf16.msra.mxu1 %v2790_v14  ;;  %2244 = vmatprep.subr.bf16.mxu0 %v2476_v54  ;;  %v717_v5 = vsel %vm691_vm2, %v664_v48, %v665_v49 }
  0xd4   : > { %v666_v63 = vrot.slane %v2939_v56, 7  ;;  %v1056_v2 = vpack.c.bf16 %v2939_v56, %v2921_v42  ;;  %v667_v6 = vrot.slane %v2937_v55, 7  ;;  %2292 = vmatprep.subr.bf16.mxu1 %v2794_v16 }
  0xd5   : > { %v454_v0 = vpop.permute.xlu1 %453  ;;  %v449_v1 = vpop.permute.xlu0 %448  ;;  %2214 = vmatprep.mubr.bf16.mxu0 %v1023_v62 }
  0xd6   : > { %v2955_v7 = vmul.f32 %v454_v0, %v347_v58  ;;  %v2957_v8 = vmul.f32 %v449_v1, %v346_v61  ;;  %v716_v14 = vsel %vm691_vm2, %v665_v49, %v666_v63  ;;  %2167 = vmatmul.mubr.bf16.gmra.mrb[4].mxu1 %v1056_v2  ;;  %2245 = vmatpush3.bf16.msra.mxu0 %v2476_v54  ;;  %v2480_v58 = vld [vmem:[#allocation2 + $0xa8] sm:$0xff]   ;;  %v858_v0 = vrot.slane %v2886_v11, 1  ;;  %v355_v1 = vld [vmem:[%s2864_s14 + $0x90] sm:$0xff] }
  0xd7   : > { %v1024_v17 = vpack.c.bf16 %v716_v14, %v717_v5  ;;  %2300 = vmatpush3.bf16.msra.mxu1 %v2794_v16  ;;  %2246 = vmatprep.subr.bf16.mxu0 %v2477_v4  ;;  %v715_v16 = vsel %vm691_vm2, %v666_v63, %v667_v6  ;;  %v354_v2 = vld [vmem:[%s2864_s14 + $0x88] sm:$0xff]  ;;  %v353_v5 = vld [vmem:[%s2864_s14 + $0x80] sm:$0xff]  ;;  %v857_v14 = vrot.slane %v2868_v59, 1 }
  0xd8   : > { %v668_v18 = vrot.slane %v2957_v8, 7  ;;  %v669_v22 = vrot.slane %v2955_v7, 7  ;;  %v1057_v27 = vpack.c.bf16 %v2957_v8, %v2937_v55  ;;  %2293 = vmatprep.subr.bf16.mxu1 %v2802_v20 }
  0xd9   : > { %v464_v23 = vpop.permute.xlu1 %463  ;;  %v459_v24 = vpop.permute.xlu0 %458  ;;  %2215 = vmatmul.mubr.bf16.gmra.mrb[4].mxu0 %v1024_v17  ;;  %v2481_v17 = vld [vmem:[#allocation2 + $0xb0] sm:$0xff]  }
  0xda   : > { %v2970_v29 = vmul.f32 %v464_v23, %v349_v44  ;;  %v2972_v30 = vmul.f32 %v459_v24, %v348_v9  ;;  %v714_v32 = vsel %vm691_vm2, %v667_v6, %v668_v18  ;;  %2170 = vmatprep.mubr.bf16.mxu1 %v1057_v27  ;;  %2247 = vmatpush3.bf16.msra.mxu0 %v2477_v4  ;;  %v357_v24 = vld [vmem:[%s2864_s14 + $0xa0] sm:$0xff]  ;;  %v356_v27 = vld [vmem:[%s2864_s14 + $0x98] sm:$0xff] }
  0xdb   : > { %v1025_v36 = vpack.c.bf16 %v714_v32, %v715_v16  ;;  %2301 = vmatpush3.bf16.msra.mxu1 %v2802_v20  ;;  %2248 = vmatprep.subr.bf16.mxu0 %v2478_v28  ;;  %v713_v48 = vsel %vm691_vm2, %v668_v18, %v669_v22  ;;  %v918_v32 = vsel %vm888_vm1, %v857_v14, %v858_v0  ;;  %v860_v16 = vrot.slane %v2893_v19, 1 }
  0xdc   : > { %v670_v38 = vrot.slane %v2972_v30, 7  ;;  %v1058_v46 = vpack.c.bf16 %v2972_v30, %v2955_v7  ;;  %v671_v35 = vrot.slane %v2970_v29, 7  ;;  %2294 = vmatprep.subr.bf16.mxu1 %v2808_v25 }
  0xdd   : > { %v474_v40 = vpop.permute.xlu1 %473  ;;  %v469_v45 = vpop.permute.xlu0 %468  ;;  %2218 = vmatprep.mubr.bf16.mxu0 %v1025_v36 }
  0xde   : > { %v2987_v49 = vmul.f32 %v474_v40, %v351_v33  ;;  %v2989_v50 = vmul.f32 %v469_v45, %v350_v34  ;;  %v712_v20 = vsel %vm691_vm2, %v669_v22, %v670_v38  ;;  %2171 = vmatmul.mubr.bf16.gmra.mrb[8].mxu1 %v1058_v46  ;;  %2249 = vmatpush3.bf16.msra.mxu0 %v2478_v28  ;;  %v859_v33 = vrot.slane %v2895_v21, 1 }
  0xdf   : > { %v1026_v52 = vpack.c.bf16 %v712_v20, %v713_v48  ;;  %2302 = vmatpush3.bf16.msra.mxu1 %v2808_v25  ;;  %2250 = vmatprep.subr.bf16.mxu0 %v2479_v47  ;;  %v711_v25 = vsel %vm691_vm2, %v670_v38, %v671_v35  ;;  %v862_v38 = vrot.slane %v2921_v42, 1  ;;  %v861_v40 = vrot.slane %v2923_v43, 1  ;;  %v358_v20 = vld [vmem:[%s2864_s14 + $0xa8] sm:$0xff] }
  0xe0   : > { %v672_v53 = vrot.slane %v2989_v50, 7  ;;  %v1059_v57 = vpack.c.bf16 %v2989_v50, %v2970_v29  ;;  %2295 = vmatprep.subr.bf16.mxu1 %v2820_v31  ;;  %v673_v61 = vrot.slane %v2987_v49, 7  ;;  %v919_v21 = vsel %vm888_vm1, %v856_v15, %v857_v14 }
  0xe1   : > { %v484_v54 = vpop.permute.xlu1 %483  ;;  %v479_v10 = vpop.permute.xlu0 %478  ;;  %2219 = vmatmul.mubr.bf16.gmra.mrb[8].mxu0 %v1026_v52  ;;  %v916_v15 = vsel %vm888_vm1, %v859_v33, %v860_v16  ;;  %v915_v14 = vsel %vm888_vm1, %v860_v16, %v861_v40 }
  0xe2   : > { %v3001_v62 = vmul.f32 %v479_v10, %v352_v51  ;;  %v710_v63 = vsel %vm691_vm2, %v671_v35, %v672_v53  ;;  %2174 = vmatprep.mubr.bf16.mxu1 %v1059_v57  ;;  %2251 = vmatpush3.bf16.msra.mxu0 %v2479_v47  ;;  %v709_v59 = vsel %vm691_vm2, %v672_v53, %v673_v61  ;;  %v2482_v47 = vld [vmem:[#allocation2 + $0xb8] sm:$0xff]  }
  0xe3   : > { %v1027_v4 = vpack.c.bf16 %v710_v63, %v711_v25  ;;  %2303 = vmatpush3.bf16.msra.mxu1 %v2820_v31  ;;  %2252 = vmatprep.subr.bf16.mxu0 %v2480_v58  ;;  %v3027_v23 = vmul.f32 %v484_v54, %v353_v5  ;;  %v1504_v35 = vpack.c.bf16 %v918_v32, %v919_v21  ;;  %v360_v5 = vld [vmem:[%s2864_s14 + $0xb8] sm:$0xff]  ;;  %v362_v32 = vld [vmem:[%s2864_s14 + $0xc8] sm:$0xff]  ;;  %v868_v21 = vrot.slane %v2970_v29, 1 }
  0xe4   : > { %v674_v6 = vrot.slane %v3001_v62, 7  ;;  %v1060_v11 = vpack.c.bf16 %v3001_v62, %v2987_v49  ;;  %2296 = vmatprep.subr.bf16.mxu1 %v2831_v37  ;;  %v917_v53 = vsel %vm888_vm1, %v858_v0, %v859_v33 }
  0xe5   : > { %v494_v44 = vpop.permute.xlu1 %493  ;;  %v489_v9 = vpop.permute.xlu0 %488  ;;  %2222 = vmatprep.mubr.bf16.mxu0 %v1027_v4 }
  0xe6   : > { %v3016_v18 = vmul.f32 %v494_v44, %v355_v1  ;;  %v3018_v22 = vmul.f32 %v489_v9, %v354_v2  ;;  %v708_v31 = vsel %vm691_vm2, %v673_v61, %v674_v6  ;;  %2175 = vmatmul.mubr.bf16.gmra.mrb[12].mxu1 %v1060_v11  ;;  %2253 = vmatpush3.bf16.msra.mxu0 %v2480_v58  ;;  %v864_v1 = vrot.slane %v2937_v55, 1 }
  0xe7   : > { %v1028_v28 = vpack.c.bf16 %v708_v31, %v709_v59  ;;  %2304 = vmatpush3.bf16.msra.mxu1 %v2831_v37  ;;  %2254 = vmatprep.subr.bf16.mxu0 %v2481_v17  ;;  %v914_v58 = vsel %vm888_vm1, %v861_v40, %v862_v38  ;;  %v863_v2 = vrot.slane %v2939_v56, 1  ;;  %v866_v44 = vrot.slane %v2955_v7, 1 }
  0xe8   : > { %v677_v34 = vrot.slane %v3016_v18, 7  ;;  %v676_v36 = vrot.slane %v3018_v22, 7  ;;  %v1061_v19 = vpack.c.bf16 %v3018_v22, %v3027_v23  ;;  %2297 = vmatprep.subr.bf16.mxu1 %v2838_v41  ;;  %v865_v9 = vrot.slane %v2957_v8, 1  ;;  %v363_v8 = vld [vmem:[%s2864_s14 + $0xd0] sm:$0xff] }
  0xe9   : > { %v504_v45 = vpop.permute.xlu1 %503  ;;  %v499_v46 = vpop.permute.xlu0 %498  ;;  %2223 = vmatmul.mubr.bf16.gmra.mrb[12].mxu0 %v1028_v28  ;;  %v1505_v56 = vpack.c.bf16 %v916_v15, %v917_v53  ;;  %v1506_v28 = vpack.c.bf16 %v914_v58, %v915_v14  ;;  %v912_v16 = vsel %vm888_vm1, %v863_v2, %v864_v1 }
  0xea   : > { %v3051_v37 = vsel %vm691_vm2, %v676_v36, %v677_v34  ;;  %v3053_v43 = vmul.f32 %v504_v45, %v357_v24  ;;  %v3055_v48 = vmul.f32 %v499_v46, %v356_v27  ;;  %2178 = vmatprep.mubr.bf16.mxu1 %v1061_v19  ;;  %2255 = vmatpush3.bf16.msra.mxu0 %v2481_v17 }
  0xeb   : > { %2258 = vmatprep.mubr.bf16.mxu0 %v1504_v35  ;;  %2256 = vmatprep.subr.bf16.mxu0 %v2482_v47  ;;  %v913_v46 = vsel %vm888_vm1, %v862_v38, %v863_v2  ;;  %v910_v19 = vsel %vm888_vm1, %v865_v9, %v866_v44  ;;  %v911_v15 = vsel %vm888_vm1, %v864_v1, %v865_v9 }
  0xec   : > { %v679_v51 = vrot.slane %v3053_v43, 7  ;;  %v678_v52 = vrot.slane %v3055_v48, 7  ;;  %v1062_v57 = vpack.c.bf16 %v3055_v48, %v3016_v18  ;;  %2305 = vmatpush3.bf16.msra.mxu1 %v2838_v41  ;;  %v361_v41 = vld [vmem:[%s2864_s14 + $0xc0] sm:$0xff]  ;;  %v1508_v14 = vpack.c.bf16 %v910_v19, %v911_v15 }
  0xed   : > { %v514_v54 = vpop.permute.xlu1 %513  ;;  %v509_v10 = vpop.permute.xlu0 %508 }
  0xee   : > { %v3074_v61 = vsel %vm691_vm2, %v677_v34, %v678_v52  ;;  %v3076_v63 = vmul.f32 %v514_v54, %v359_v60  ;;  %v3078_v25 = vmul.f32 %v509_v10, %v358_v20  ;;  %v3082_v0 = vsel %vm691_vm2, %v678_v52, %v679_v51  ;;  %2179 = vmatmul.mubr.bf16.gmra.mrb[16].mxu1 %v1062_v57  ;;  %v364_v52 = vld [vmem:[%s2864_s14 + $0xd8] sm:$0xff] }
  0xef   : > { %v1030_v4 = vpack.c.bf16 %v3074_v61, %v3051_v37  ;;  %2257 = vmatpush3.bf16.msra.mxu0 %v2482_v47  ;;  %v867_v47 = vrot.slane %v2972_v30, 1  ;;  %v365_v30 = vld [vmem:[%s2864_s14 + $0xe0] sm:$0xff]  ;;  %v870_v54 = vrot.slane %v2987_v49, 1  ;;  %v869_v10 = vrot.slane %v2989_v50, 1 }
  0xf0   : > { %v681_v11 = vrot.slane %v3076_v63, 7  ;;  %v680_v55 = vrot.slane %v3078_v25, 7  ;;  %v1063_v59 = vpack.c.bf16 %v3078_v25, %v3053_v43  ;;  %v877_v49 = vrot.slane %v3078_v25, 1 }
  0xf1   : > { %v524_v17 = vpop.permute.xlu1 %523  ;;  %v519_v31 = vpop.permute.xlu0 %518  ;;  %v908_v9 = vsel %vm888_vm1, %v867_v47, %v868_v21  ;;  %v909_v50 = vsel %vm888_vm1, %v866_v44, %v867_v47  ;;  %v906_v44 = vsel %vm888_vm1, %v869_v10, %v870_v54 }
  0xf2   : > { %v3098_v24 = vmul.f32 %v524_v17, %v361_v41  ;;  %v3100_v27 = vmul.f32 %v519_v31, %v360_v5  ;;  %v3104_v7 = vsel %vm691_vm2, %v679_v51, %v680_v55  ;;  %2259 = vmatmul.mubr.bf16.vlgmr.msra.gmra.mrb[0].mxu0 %v1505_v56  ;;  %2182 = vmatprep.mubr.bf16.mxu1 %v1063_v59  ;;  %v367_v17 = vld [vmem:[%s2864_s14 + $0xf0] sm:$0xff]  ;;  %v366_v31 = vld [vmem:[%s2864_s14 + $0xe8] sm:$0xff]  ;;  %s2511_s14 = scalar_lea.vmem %s3375_s26, 4096 }
  0xf3   : > { %v1031_v33 = vpack.c.bf16 %v3104_v7, %v3082_v0  ;;  %v3114_v34 = vsel %vm691_vm2, %v680_v55, %v681_v11  ;;  %2262 = vmatprep.mubr.bf16.mxu0 %v1506_v28  ;;  %v1507_v41 = vpack.c.bf16 %v912_v16, %v913_v46  ;;  %v907_v16 = vsel %vm888_vm1, %v868_v21, %v869_v10  ;;  %p2512_p12 = scmp.ne.s32.totalorder %s3375_s26, %s2511_s14  ;;  %p2519_p7 = scmp.lt.s32.totalorder %s2517_s27, %s2511_s14 }
  0xf4   : > { %v683_v40 = vrot.slane %v3098_v24, 7  ;;  %v682_v45 = vrot.slane %v3100_v27, 7  ;;  %v1064_v20 = vpack.c.bf16 %v3100_v27, %v3076_v63  ;;  %v871_v21 = vrot.slane %v3001_v62, 1 }
  0xf5   : > { %v534_v35 = vpop.permute.xlu1 %533  ;;  %v529_v60 = vpop.permute.xlu0 %528  ;;  %v880_v25 = vrot.slane %v3098_v24, 1  ;;  %p2513_p2 = pnand %p2512_p12, %p3451_p0  ;;  %p2520_p9 = por %p2519_p7, %p2518_p6 }
  0xf6   : > { %v3130_v51 = vmul.f32 %v534_v35, %v363_v8  ;;  %v3132_v42 = vmul.f32 %v529_v60, %v362_v32  ;;  %v3136_v38 = vsel %vm691_vm2, %v681_v11, %v682_v45  ;;  %v3140_v29 = vsel %vm691_vm2, %v682_v45, %v683_v40  ;;  %2183 = vmatmul.mubr.bf16.gmra.mrb[20].mxu1 %v1064_v20 }
  0xf7   : > { %v1032_v53 = vpack.c.bf16 %v3136_v38, %v3114_v34  ;;  %v872_v45 = vrot.slane %v3027_v23, 1  ;;  %v1509_v35 = vpack.c.bf16 %v908_v9, %v909_v50  ;;  %p2514_p5 = pneg %p2513_p2 }
  0xf8   : > { %v685_v57 = vrot.slane %v3130_v51, 7  ;;  %v684_v58 = vrot.slane %v3132_v42, 7  ;;  %v1065_v5 = vpack.c.bf16 %v3132_v42, %v3098_v24  ;;  %v881_v37 = vrot.slane %v3132_v42, 1 }
  0xf9   : > { %v544_v1 = vpop.permute.xlu1 %543  ;;  %v539_v2 = vpop.permute.xlu0 %538  ;;  %p2521_p11 = pnand %p2520_p9, %p2514_p5 }
  0xfa   : > { %v3154_v11 = vmul.f32 %v544_v1, %v365_v30  ;;  %v3156_v55 = vmul.f32 %v539_v2, %v364_v52  ;;  %v3162_v56 = vsel %vm691_vm2, %v683_v40, %v684_v58  ;;  %2263 = vmatmul.mubr.bf16.gmra.mrb[4].mxu0 %v1507_v41  ;;  %2186 = vmatprep.mubr.bf16.mxu1 %v1065_v5  ;;  %v675_v40 = vrot.slane %v3027_v23, 7 }
  0xfb   : > { %v1033_v59 = vpack.c.bf16 %v3162_v56, %v3140_v29  ;;  %v3170_v28 = vsel %vm691_vm2, %v684_v58, %v685_v57  ;;  %2266 = vmatprep.mubr.bf16.mxu0 %v1508_v14  ;;  %v1510_v52 = vpack.c.bf16 %v906_v44, %v907_v16  ;;  %v895_v24 = vsel %vm888_vm1, %v880_v25, %v881_v37 }
  0xfc   : > { %v687_v8 = vrot.slane %v3154_v11, 7  ;;  %v686_v32 = vrot.slane %v3156_v55, 7  ;;  %v1066_v47 = vpack.c.bf16 %v3156_v55, %v3130_v51  ;;  %v884_v23 = vrot.slane %v3154_v11, 1 }
  0xfd   : > { %v554_v46 = vpop.permute.xlu1 %553  ;;  %v549_v19 = vpop.permute.xlu0 %548  ;;  %v706_v9 = vsel %vm691_vm2, %v675_v40, %v676_v36  ;;  %v883_v7 = vrot.slane %v3156_v55, 1 }
  0xfe   : > { %v591_v60 = vmul.f32 %v554_v46, %v367_v17  ;;  %v590_v20 = vmul.f32 %v549_v19, %v366_v31  ;;  %v3186_v15 = vsel %vm691_vm2, %v685_v57, %v686_v32  ;;  %v3190_v30 = vsel %vm691_vm2, %v686_v32, %v687_v8  ;;  %2187 = vmatmul.mubr.bf16.gmra.mrb[24].mxu1 %v1066_v47 }
  0xff   : > { %v1034_v10 = vpack.c.bf16 %v3186_v15, %v3170_v28  ;;  %v874_v57 = vrot.slane %v3016_v18, 1  ;;  %v873_v32 = vrot.slane %v3018_v22, 1  ;;  %v904_v47 = vsel %vm888_vm1, %v871_v21, %v872_v45 }
 0x100   : > { %v689_v58 = vrot.slane %v591_v60, 7  ;;  %v886_v1 = vrot.slane %v591_v60, 1  ;;  %v688_v2 = vrot.slane %v590_v20, 7  ;;  %v885_v41 = vrot.slane %v590_v20, 1 }
 0x101   : > { %v1067_v5 = vpack.c.bf16 %v590_v20, %v3154_v11  ;;  %v1068_v14 = vpack.c.bf16 %v2877_v3, %v591_v60  ;;  %v902_v3 = vsel %vm888_vm1, %v873_v32, %v874_v57  ;;  %v878_v60 = vrot.slane %v3076_v63, 1 }
 0x102   : > { %v694_v50 = vsel %vm691_vm2, %v687_v8, %v688_v2  ;;  %v890_v17 = vsel %vm888_vm1, %v885_v41, %v886_v1  ;;  %v891_v18 = vsel %vm888_vm1, %v884_v23, %v885_v41  ;;  %v692_v31 = vsel %vm691_vm2, %v689_v58, %v690_v12  ;;  %2267 = vmatmul.mubr.bf16.gmra.mrb[8].mxu0 %v1509_v35 }
 0x103   : > { %2190 = vmatprep.mubr.bf16.mxu1 %v1067_v5  ;;  %v1035_v36 = vpack.c.bf16 %v694_v50, %v3190_v30  ;;  %v1518_v8 = vpack.c.bf16 %v890_v17, %v891_v18  ;;  %v693_v44 = vsel %vm691_vm2, %v688_v2, %v689_v58  ;;  %2270 = vmatprep.mubr.bf16.mxu0 %v1510_v52 }
 0x104   : > { %v1036_v16 = vpack.c.bf16 %v692_v31, %v693_v44  ;;  %v889_v46 = vsel %vm888_vm1, %v886_v1, %v887_v13  ;;  %v707_v12 = vsel %vm691_vm2, %v674_v6, %v675_v40  ;;  %v905_v35 = vsel %vm888_vm1, %v870_v54, %v871_v21 }
 0x105   : > { %v1519_v22 = vpack.c.bf16 %v2918_v39, %v889_v46  ;;  %v1029_v19 = vpack.c.bf16 %v706_v9, %v707_v12  ;;  %v903_v13 = vsel %vm888_vm1, %v872_v45, %v873_v32  ;;  %v1511_v62 = vpack.c.bf16 %v904_v47, %v905_v35 }
 0x106   : > { %2191 = vmatmul.mubr.bf16.gmra.mrb[28].mxu1 %v1068_v14  ;;  %v876_v39 = vrot.slane %v3053_v43, 1  ;;  %v875_v6 = vrot.slane %v3055_v48, 1  ;;  %v1512_v40 = vpack.c.bf16 %v902_v3, %v903_v13  ;;  %v898_v43 = vsel %vm888_vm1, %v877_v49, %v878_v60 }
 0x107   : > { %2226 = vmatprep.mubr.bf16.mxu1 %v1029_v19  ;;  %v879_v45 = vrot.slane %v3100_v27, 1  ;;  %v882_v21 = vrot.slane %v3130_v51, 1  ;;  %v892_v34 = vsel %vm888_vm1, %v883_v7, %v884_v23 }
 0x108   : > { %v900_v54 = vsel %vm888_vm1, %v875_v6, %v876_v39  ;;  %v901_v20 = vsel %vm888_vm1, %v874_v57, %v875_v6  ;;  %v899_v48 = vsel %vm888_vm1, %v876_v39, %v877_v49  ;;  %v3296_v57 = vld [vmem:[%s3438_s4] ss:$0 sm:$0xff] }
 0x109   : > { %v1513_v63 = vpack.c.bf16 %v900_v54, %v901_v20  ;;  %v1514_v30 = vpack.c.bf16 %v898_v43, %v899_v48  ;;  %v896_v61 = vsel %vm888_vm1, %v879_v45, %v880_v25  ;;  %v894_v0 = vsel %vm888_vm1, %v881_v37, %v882_v21 }
 0x10a   : > { %2271 = vmatmul.mubr.bf16.gmra.mrb[12].mxu0 %v1511_v62  ;;  %v893_v51 = vsel %vm888_vm1, %v882_v21, %v883_v7 }
 0x10b   : > { %2274 = vmatprep.mubr.bf16.mxu0 %v1512_v40  ;;  %v1517_v42 = vpack.c.bf16 %v892_v34, %v893_v51 }
 0x10e   : > { %2227 = vmatmul.mubr.bf16.vlgmr.msra.gmra.mrb[16].mxu1 %v1030_v4  ;;  %v897_v4 = vsel %vm888_vm1, %v878_v60, %v879_v45 }
 0x10f   : > { %2230 = vmatprep.mubr.bf16.mxu1 %v1031_v33  ;;  %v1515_v27 = vpack.c.bf16 %v896_v61, %v897_v4  ;;  %v1516_v33 = vpack.c.bf16 %v894_v0, %v895_v24 }
 0x112   : > { %2275 = vmatmul.mubr.bf16.gmra.mrb[16].mxu0 %v1513_v63 }
 0x113   : > { %2278 = vmatprep.mubr.bf16.mxu0 %v1514_v30 }
 0x116   : > { %2231 = vmatmul.mubr.bf16.gmra.mrb[20].mxu1 %v1032_v53 }
 0x117   : > { %2234 = vmatprep.mubr.bf16.mxu1 %v1033_v59 }
 0x11a   : > { %2279 = vmatmul.mubr.bf16.gmra.mrb[20].mxu0 %v1515_v27 }
 0x11b   : > { %2282 = vmatprep.mubr.bf16.mxu0 %v1516_v33 }
 0x11e   : > { %2235 = vmatmul.mubr.bf16.gmra.mrb[24].mxu1 %v1034_v10 }
 0x11f   : > { %2238 = vmatprep.mubr.bf16.mxu1 %v1035_v36 }
 0x122   : > { %2283 = vmatmul.mubr.bf16.gmra.mrb[24].mxu0 %v1517_v42 }
 0x123   : > { %2286 = vmatprep.mubr.bf16.mxu0 %v1518_v8 }
 0x126   : > { %2239 = vmatmul.mubr.bf16.gmra.mrb[28].mxu1 %v1036_v16 }
 0x12a   : > { %2287 = vmatmul.mubr.bf16.gmra.mrb[28].mxu0 %v1519_v22 }
 0x1a1   : > { %v2164_v38 = vpop.f32.mrb[0].mxu1 }
 0x1a2   : > { %v1168_v29 = vpop.f32.mrb[1].mxu1 }
 0x1a3   : > { %v2165_v53 = vpop.f32.mrb[2].mxu1 }
 0x1a4   : > { %v1171_v11 = vpop.f32.mrb[3].mxu1 }
 0x1a9   : > { %v2168_v55 = vpop.f32.mrb[4].mxu1 }
 0x1aa   : > { %v1184_v56 = vpop.f32.mrb[5].mxu1 }
 0x1ab   : > { %v2169_v26 = vpop.f32.mrb[6].mxu1 }
 0x1ac   : > { %v1187_v59 = vpop.f32.mrb[7].mxu1 }
 0x1b1   : > { %v2172_v23 = vpop.f32.mrb[8].mxu1 }
 0x1b2   : > { %v1200_v52 = vpop.f32.mrb[9].mxu1 }
 0x1b3   : > { %v2173_v28 = vpop.f32.mrb[10].mxu1 }
 0x1b4   : > { %v1203_v15 = vpop.f32.mrb[11].mxu1 }
 0x1b9   : > { %v3284_v10 = vpop.f32.mrb[12].mxu1 }
 0x1ba   : > { %v3286_v58 = vpop.f32.mrb[13].mxu1 }
 0x1bb   : > { %v3288_v1 = vpop.f32.mrb[14].mxu1 }
 0x1bc   : > { %v3290_v2 = vpop.f32.mrb[15].mxu1 }
 0x1c5   : > { %v2260_v41 = vpop.f32.mrb[0].mxu0 }
 0x1c6   : > { %v2306_v5 = vadd.f32 %v2260_v41, %v2164_v38  ;;  %v1619_v14 = vpop.f32.mrb[1].mxu0 }
 0x1c7   : > { %v2307_v9 = vadd.f32 %v1619_v14, %v1168_v29  ;;  %v2261_v50 = vpop.f32.mrb[2].mxu0 }
 0x1c8   : > { %v1787_v17 = vadd.f32 %v2306_v5, %v3296_v57  ;;  %v2308_v18 = vadd.f32 %v2261_v50, %v2165_v53  ;;  %v1622_v31 = vpop.f32.mrb[3].mxu0 }
 0x1c9   : > { %v1785_v32 = vadd.f32 %v2307_v9, %v3296_v57  ;;  %v2309_v36 = vadd.f32 %v1622_v31, %v1171_v11 }
 0x1ca   : > { %v1819_v8 = vmax.f32 %v1787_v17, 0.0  ;;  %v1788_v44 = vadd.f32 %v2308_v18, %v3296_v57 }
 0x1cb   : > { %v1817_v16 = vmax.f32 %v1785_v32, 0.0  ;;  %v1786_v46 = vadd.f32 %v2309_v36, %v3296_v57 }
 0x1cc   : > { %1851 = vst [vmem:[%s3304_s6 + $0x10] sm:$0xff] %v1819_v8  ;;  %v1820_v12 = vmax.f32 %v1788_v44, 0.0 }
 0x1cd   : > { %1849 = vst [vmem:[%s3304_s6] sm:$0xff] %v1817_v16  ;;  %v1818_v22 = vmax.f32 %v1786_v46, 0.0  ;;  %v2264_v19 = vpop.f32.mrb[4].mxu0 }
 0x1ce   : > { %1852 = vst [vmem:[%s3304_s6 + $0x18] sm:$0xff] %v1820_v12  ;;  %v2310_v47 = vadd.f32 %v2264_v19, %v2168_v55  ;;  %v1635_v35 = vpop.f32.mrb[5].mxu0 }
 0x1cf   : > { %1850 = vst [vmem:[%s3304_s6 + $0x8] sm:$0xff] %v1818_v22  ;;  %v2311_v3 = vadd.f32 %v1635_v35, %v1184_v56  ;;  %v2265_v13 = vpop.f32.mrb[6].mxu0 }
 0x1d0   : > { %v1791_v62 = vadd.f32 %v2310_v47, %v3296_v57  ;;  %v2312_v39 = vadd.f32 %v2265_v13, %v2169_v26  ;;  %v1638_v6 = vpop.f32.mrb[7].mxu0 }
 0x1d1   : > { %v1789_v40 = vadd.f32 %v2311_v3, %v3296_v57  ;;  %v2313_v60 = vadd.f32 %v1638_v6, %v1187_v59 }
 0x1d2   : > { %v1823_v49 = vmax.f32 %v1791_v62, 0.0  ;;  %v1792_v54 = vadd.f32 %v2312_v39, %v3296_v57 }
 0x1d3   : > { %v1821_v20 = vmax.f32 %v1789_v40, 0.0  ;;  %v1790_v43 = vadd.f32 %v2313_v60, %v3296_v57 }
 0x1d4   : > { %1855 = vst [vmem:[%s3304_s6 + $0x30] sm:$0xff] %v1823_v49  ;;  %v1824_v48 = vmax.f32 %v1792_v54, 0.0 }
 0x1d5   : > { %1853 = vst [vmem:[%s3304_s6 + $0x20] sm:$0xff] %v1821_v20  ;;  %v1822_v63 = vmax.f32 %v1790_v43, 0.0  ;;  %v2268_v25 = vpop.f32.mrb[8].mxu0 }
 0x1d6   : > { %1856 = vst [vmem:[%s3304_s6 + $0x38] sm:$0xff] %v1824_v48  ;;  %v2314_v45 = vadd.f32 %v2268_v25, %v2172_v23  ;;  %v1651_v30 = vpop.f32.mrb[9].mxu0 }
 0x1d7   : > { %1854 = vst [vmem:[%s3304_s6 + $0x28] sm:$0xff] %v1822_v63  ;;  %v2315_v21 = vadd.f32 %v1651_v30, %v1200_v52  ;;  %v2269_v37 = vpop.f32.mrb[10].mxu0 }
 0x1d8   : > { %v1795_v61 = vadd.f32 %v2314_v45, %v3296_v57  ;;  %v2316_v4 = vadd.f32 %v2269_v37, %v2173_v28  ;;  %v1654_v0 = vpop.f32.mrb[11].mxu0 }
 0x1d9   : > { %v1793_v24 = vadd.f32 %v2315_v21, %v3296_v57  ;;  %v2317_v27 = vadd.f32 %v1654_v0, %v1203_v15 }
 0x1da   : > { %v1827_v7 = vmax.f32 %v1795_v61, 0.0  ;;  %v1796_v33 = vadd.f32 %v2316_v4, %v3296_v57 }
 0x1db   : > { %v1825_v34 = vmax.f32 %v1793_v24, 0.0  ;;  %v1794_v51 = vadd.f32 %v2317_v27, %v3296_v57 }
 0x1dc   : > { %1859 = vst [vmem:[%s3304_s6 + $0x50] sm:$0xff] %v1827_v7  ;;  %v1828_v42 = vmax.f32 %v1796_v33, 0.0 }
 0x1dd   : > { %1857 = vst [vmem:[%s3304_s6 + $0x40] sm:$0xff] %v1825_v34  ;;  %v1826_v38 = vmax.f32 %v1794_v51, 0.0  ;;  %v2272_v29 = vpop.f32.mrb[12].mxu0 }
 0x1de   : > { %1860 = vst [vmem:[%s3304_s6 + $0x58] sm:$0xff] %v1828_v42  ;;  %v2318_v53 = vadd.f32 %v2272_v29, %v3284_v10  ;;  %v1667_v11 = vpop.f32.mrb[13].mxu0 }
 0x1df   : > { %1858 = vst [vmem:[%s3304_s6 + $0x48] sm:$0xff] %v1826_v38  ;;  %v2319_v55 = vadd.f32 %v1667_v11, %v3286_v58  ;;  %v2273_v56 = vpop.f32.mrb[14].mxu0 }
 0x1e0   : > { %v1799_v26 = vadd.f32 %v2318_v53, %v3296_v57  ;;  %v2320_v59 = vadd.f32 %v2273_v56, %v3288_v1  ;;  %v1670_v23 = vpop.f32.mrb[15].mxu0 }
 0x1e1   : > { %v1797_v52 = vadd.f32 %v2319_v55, %v3296_v57  ;;  %v2321_v28 = vadd.f32 %v1670_v23, %v3290_v2  ;;  %v2228_v15 = vpop.f32.mrb[16].mxu1 }
 0x1e2   : > { %v1831_v10 = vmax.f32 %v1799_v26, 0.0  ;;  %v1800_v41 = vadd.f32 %v2320_v59, %v3296_v57  ;;  %v1441_v5 = vpop.f32.mrb[17].mxu1 }
 0x1e3   : > { %v1829_v14 = vmax.f32 %v1797_v52, 0.0  ;;  %v1798_v58 = vadd.f32 %v2321_v28, %v3296_v57  ;;  %v2229_v9 = vpop.f32.mrb[18].mxu1 }
 0x1e4   : > { %1863 = vst [vmem:[%s3304_s6 + $0x70] sm:$0xff] %v1831_v10  ;;  %v1832_v50 = vmax.f32 %v1800_v41, 0.0  ;;  %v1444_v17 = vpop.f32.mrb[19].mxu1 }
 0x1e5   : > { %1861 = vst [vmem:[%s3304_s6 + $0x60] sm:$0xff] %v1829_v14  ;;  %v1830_v1 = vmax.f32 %v1798_v58, 0.0  ;;  %v2276_v18 = vpop.f32.mrb[16].mxu0 }
 0x1e6   : > { %1864 = vst [vmem:[%s3304_s6 + $0x78] sm:$0xff] %v1832_v50  ;;  %v2322_v31 = vadd.f32 %v2276_v18, %v2228_v15  ;;  %v1683_v32 = vpop.f32.mrb[17].mxu0 }
 0x1e7   : > { %1862 = vst [vmem:[%s3304_s6 + $0x68] sm:$0xff] %v1830_v1  ;;  %v2323_v2 = vadd.f32 %v1683_v32, %v1441_v5  ;;  %v2277_v36 = vpop.f32.mrb[18].mxu0 }
 0x1e8   : > { %v1803_v8 = vadd.f32 %v2322_v31, %v3296_v57  ;;  %v2324_v44 = vadd.f32 %v2277_v36, %v2229_v9  ;;  %v1686_v16 = vpop.f32.mrb[19].mxu0 }
 0x1e9   : > { %v1801_v46 = vadd.f32 %v2323_v2, %v3296_v57  ;;  %v2325_v12 = vadd.f32 %v1686_v16, %v1444_v17  ;;  %v2232_v22 = vpop.f32.mrb[20].mxu1 }
 0x1ea   : > { %v1835_v19 = vmax.f32 %v1803_v8, 0.0  ;;  %v1804_v47 = vadd.f32 %v2324_v44, %v3296_v57  ;;  %v1457_v35 = vpop.f32.mrb[21].mxu1 }
 0x1eb   : > { %v1833_v3 = vmax.f32 %v1801_v46, 0.0  ;;  %v1802_v13 = vadd.f32 %v2325_v12, %v3296_v57  ;;  %v2233_v62 = vpop.f32.mrb[22].mxu1 }
 0x1ec   : > { %1867 = vst [vmem:[%s3304_s6 + $0x90] sm:$0xff] %v1835_v19  ;;  %v1836_v39 = vmax.f32 %v1804_v47, 0.0  ;;  %v1460_v6 = vpop.f32.mrb[23].mxu1 }
 0x1ed   : > { %1865 = vst [vmem:[%s3304_s6 + $0x80] sm:$0xff] %v1833_v3  ;;  %v1834_v40 = vmax.f32 %v1802_v13, 0.0  ;;  %v2280_v60 = vpop.f32.mrb[20].mxu0 }
 0x1ee   : > { %1868 = vst [vmem:[%s3304_s6 + $0x98] sm:$0xff] %v1836_v39  ;;  %v2326_v49 = vadd.f32 %v2280_v60, %v2232_v22  ;;  %v1699_v54 = vpop.f32.mrb[21].mxu0 }
 0x1ef   : > { %1866 = vst [vmem:[%s3304_s6 + $0x88] sm:$0xff] %v1834_v40  ;;  %v2327_v20 = vadd.f32 %v1699_v54, %v1457_v35  ;;  %v2281_v43 = vpop.f32.mrb[22].mxu0 }
 0x1f0   : > { %v1807_v48 = vadd.f32 %v2326_v49, %v3296_v57  ;;  %v2328_v63 = vadd.f32 %v2281_v43, %v2233_v62  ;;  %v1702_v25 = vpop.f32.mrb[23].mxu0 }
 0x1f1   : > { %v1805_v45 = vadd.f32 %v2327_v20, %v3296_v57  ;;  %v2329_v30 = vadd.f32 %v1702_v25, %v1460_v6  ;;  %v2236_v21 = vpop.f32.mrb[24].mxu1 }
 0x1f2   : > { %v1839_v37 = vmax.f32 %v1807_v48, 0.0  ;;  %v1808_v61 = vadd.f32 %v2328_v63, %v3296_v57  ;;  %v1473_v4 = vpop.f32.mrb[25].mxu1 }
 0x1f3   : > { %v1837_v0 = vmax.f32 %v1805_v45, 0.0  ;;  %v1806_v24 = vadd.f32 %v2329_v30, %v3296_v57  ;;  %v2237_v27 = vpop.f32.mrb[26].mxu1 }
 0x1f4   : > { %1871 = vst [vmem:[%s3304_s6 + $0xb0] sm:$0xff] %v1839_v37  ;;  %v1840_v7 = vmax.f32 %v1808_v61, 0.0  ;;  %v1476_v33 = vpop.f32.mrb[27].mxu1 }
 0x1f5   : > { %1869 = vst [vmem:[%s3304_s6 + $0xa0] sm:$0xff] %v1837_v0  ;;  %v1838_v34 = vmax.f32 %v1806_v24, 0.0  ;;  %v2284_v51 = vpop.f32.mrb[24].mxu0 }
 0x1f6   : > { %1872 = vst [vmem:[%s3304_s6 + $0xb8] sm:$0xff] %v1840_v7  ;;  %v2330_v42 = vadd.f32 %v2284_v51, %v2236_v21  ;;  %v1715_v38 = vpop.f32.mrb[25].mxu0 }
 0x1f7   : > { %1870 = vst [vmem:[%s3304_s6 + $0xa8] sm:$0xff] %v1838_v34  ;;  %v2331_v29 = vadd.f32 %v1715_v38, %v1473_v4  ;;  %v2285_v53 = vpop.f32.mrb[26].mxu0 }
 0x1f8   : > { %v1811_v11 = vadd.f32 %v2330_v42, %v3296_v57  ;;  %v2332_v55 = vadd.f32 %v2285_v53, %v2237_v27  ;;  %v1718_v56 = vpop.f32.mrb[27].mxu0 }
 0x1f9   : > { %v1809_v26 = vadd.f32 %v2331_v29, %v3296_v57  ;;  %v2333_v59 = vadd.f32 %v1718_v56, %v1476_v33  ;;  %v2240_v23 = vpop.f32.mrb[28].mxu1 }
 0x1fa   : > { %v1843_v52 = vmax.f32 %v1811_v11, 0.0  ;;  %v1812_v28 = vadd.f32 %v2332_v55, %v3296_v57  ;;  %v1489_v15 = vpop.f32.mrb[29].mxu1 }
 0x1fb   : > { %v1841_v10 = vmax.f32 %v1809_v26, 0.0  ;;  %v1810_v41 = vadd.f32 %v2333_v59, %v3296_v57  ;;  %v2241_v5 = vpop.f32.mrb[30].mxu1 }
 0x1fc   : > { %1875 = vst [vmem:[%s3304_s6 + $0xd0] sm:$0xff] %v1843_v52  ;;  %v1844_v14 = vmax.f32 %v1812_v28, 0.0  ;;  %v1492_v58 = vpop.f32.mrb[31].mxu1 }
 0x1fd   : > { %1873 = vst [vmem:[%s3304_s6 + $0xc0] sm:$0xff] %v1841_v10  ;;  %v1842_v9 = vmax.f32 %v1810_v41, 0.0  ;;  %v2288_v50 = vpop.f32.mrb[28].mxu0 }
 0x1fe   : > { %1876 = vst [vmem:[%s3304_s6 + $0xd8] sm:$0xff] %v1844_v14  ;;  %v2334_v17 = vadd.f32 %v2288_v50, %v2240_v23  ;;  %v1731_v1 = vpop.f32.mrb[29].mxu0 }
 0x1ff   : > { %1874 = vst [vmem:[%s3304_s6 + $0xc8] sm:$0xff] %v1842_v9  ;;  %v2335_v18 = vadd.f32 %v1731_v1, %v1489_v15  ;;  %v2289_v31 = vpop.f32.mrb[30].mxu0 }
 0x200   : > { %v1815_v32 = vadd.f32 %v2334_v17, %v3296_v57  ;;  %v2336_v2 = vadd.f32 %v2289_v31, %v2241_v5  ;;  %v1734_v36 = vpop.f32.mrb[31].mxu0 }
 0x201   : > { %v1813_v8 = vadd.f32 %v2335_v18, %v3296_v57  ;;  %v2337_v44 = vadd.f32 %v1734_v36, %v1492_v58 }
 0x202   : > { %v1847_v16 = vmax.f32 %v1815_v32, 0.0  ;;  %v1816_v46 = vadd.f32 %v2336_v2, %v3296_v57 }
 0x203   : > { %v1845_v12 = vmax.f32 %v1813_v8, 0.0  ;;  %v1814_v22 = vadd.f32 %v2337_v44, %v3296_v57 }
 0x204   : > { %1879 = vst [vmem:[%s3304_s6 + $0xf0] sm:$0xff] %v1847_v16  ;;  %v1848_v19 = vmax.f32 %v1816_v46, 0.0 }
 0x205   : > { %1877 = vst [vmem:[%s3304_s6 + $0xe0] sm:$0xff] %v1845_v12  ;;  %v1846_v47 = vmax.f32 %v1814_v22, 0.0 }
 0x206   : > { %1880 = vst [vmem:[%s3304_s6 + $0xf8] sm:$0xff] %v1848_v19 }
 0x207   : > { %1878 = vst [vmem:[%s3304_s6 + $0xe8] sm:$0xff] %v1846_v47 }
 0x208   : > { %2524 = shalt.err (!%p2521_p11)
}
 0x209   : > { %s2525_s30 = scalar_lea.hbm %s3371_s16, 4096  ;;  %s2529_s21 = scalar_lea.hbm %s3439_s5, 16384 }
 0x20a   : > { %p2526_p13 = scmp.ne.s32.totalorder %s3371_s16, %s2525_s30  ;;  %p2530_p3 = scmp.lt.u32.totalorder %s3371_s16, %s3439_s5 }
 0x20b   : > { %p2531_p8 = scmp.lt.u32.totalorder %s2529_s21, %s2525_s30  ;;  %p2533_p12 = scmp.lt.u32.totalorder %s2525_s30, %s3371_s16 }
 0x20c   : > { %p2527_p1 = pnand %p2526_p13, %p3451_p0 }
 0x20d   : > { %p2532_p10 = por %p2531_p8, %p2530_p3 }
 0x20e   : > { %p2528_p4 = pneg %p2527_p1 }
 0x20f   : > { %p2534_p2 = por %p2533_p12, %p2532_p10 }
 0x211   : > { %p2535_p5 = pnand %p2534_p2, %p2528_p4 }
 0x213   : > { %2538 = shalt.err (!%p2535_p5)
}
 0x214   : > { %s2616_s15 = smov 128   ;;  %s2617_s14 = smov 8  }
 0x215   : > { %2374 = dma.vmem_to_hbm [thread:$0]  (%p3451_p0), %s3375_s26, 4096, %s3371_s16, %s3382_s10, %s2616_s15, %s2616_s15, %s2617_s14  }
 0x216 PF: > { %p2386_p6 = scmp.ge.s32.totalorder %s2609_s25, 2  ;;  %s1912_s12 = sand.u32 1, %s2581_s18  }
 0x217   : > { %p3452_p7 = scmp.ne.s32.totalorder %s3445_s8, 0  ;;  %s1913_s17 = scalar_lea.sflag [#allocation4], %s1912_s12 }
 0x219   : > { %p2381_p9 = pnand %p2386_p6, %p3452_p7 }
 0x21b   : > { %2576 = dma.done.wait (!%p2381_p9), %s1913_s17, 4096  }
 0x21c   : > { %2578 = vsyncadd (!%p2381_p9), %s1913_s17, 4294963200  ;;  %s19_s25 = sadd.s32 1, %s2609_s25   ;;  %s3453_s18 = smov %s2585_s19 }
 0x21d   : > { %p16_p11 = scmp.ge.s32.totalorder %s19_s25, 6   ;;  %s3454_s19 = smov %s2589_s20 }
 0x21e   : > { %s3455_s20 = smov %s2727_s13  ;;  %s3456_s21 = smov %s2601_s23 }
 0x21f   : > { %s3457_s22 = smov %s2605_s24  ;;  %s3458_s23 = smov %s3461_s28 }
 0x220   : > { %s3459_s24 = smov %s3465_s29  ;;  %18 = sbr.rel (!%p16_p11) target bundleno = 6 (0x6), region = 88 }
 0x227   :  { %1918 = vsyncpa [#allocation3], 1 }
 0x228   :  { %1920 = vsyncpa [#allocation3 + $0x1], 1 }
 0x229   :  { %1921 = vsyncpa [#allocation4], 1 }
 0x22a   :  { %1923 = vsyncpa [#allocation4 + $0x1], 1 }

</bundles_post_ra>
